<compile_context>
chip_gen: v7x
topology: tpu7x:2x2x1
jax: 0.10.0
libtpu: 0.0.40
codegen_flags: <defaults>
</compile_context>

<pallas_src>
import jax
import jax.numpy as jnp
from jax.experimental import pallas as pl
from jax.experimental.pallas import tpu as pltpu

LANE = 128      # TPU vreg lane width
SUBLANE = 8     # TPU vreg sublane count (f32)


def mlp_kernel(x_ref, w1_ref, b1_ref, w2_ref, b2_ref, o_ref):
    x = x_ref[...]                                                    # (TM, 64) f32
    h = jnp.dot(x, w1_ref[...], preferred_element_type=jnp.float32)  # (TM, 128)
    h = jnp.maximum(h + b1_ref[...], 0.0)                            # bias + ReLU
    z = jnp.dot(h, w2_ref[...], preferred_element_type=jnp.float32)  # (TM, 128)
    z = z + b2_ref[...]
    # Exact sigmoid via tanh (single EUP op): sigmoid(z) = 0.5*tanh(z/2) + 0.5
    o_ref[...] = (0.5 * jnp.tanh(0.5 * z) + 0.5).astype(o_ref.dtype)


def pad_params(w1, b1, w2, b2):
    """Pad parameters to lane-dense slabs ONCE; keep these resident.

    w1:(64,100) b1:(1,100) w2:(100,10) b2:(1,10)  ->
    w1p:(64,128) b1p:(1,128) w2p:(128,128) b2p:(1,128)
    Zero padding is mathematically inert (0 weight / 0 bias -> ReLU(0)=0,
    padded output columns are sliced off in the wrapper).
    """
    d_in, d_hidden = w1.shape
    d_out = w2.shape[1]
    w1p = jnp.zeros((d_in, LANE), jnp.float32).at[:, :d_hidden].set(w1)
    b1p = jnp.zeros((1, LANE), jnp.float32).at[:, :d_hidden].set(b1)
    w2p = jnp.zeros((LANE, LANE), jnp.float32).at[:d_hidden, :d_out].set(w2)
    b2p = jnp.zeros((1, LANE), jnp.float32).at[:, :d_out].set(b2)
    return w1p, b1p, w2p, b2p


def mymodel_forward(x, padded_params, d_out=10, tm=512):
    """x: (B, H, W) float32 images. padded_params from pad_params().

    Returns (B, d_out) sigmoid outputs, matching the PyTorch module.
    """
    w1p, b1p, w2p, b2p = padded_params
    d_in = w1p.shape[0]
    B = x.shape[0]

    # Batch tile: multiple of 8 sublanes, capped at `tm`; sized so that
    # double-buffered f32 in/out blocks fit all generations' scoped VMEM.
    TM = min(tm, pl.cdiv(B, SUBLANE) * SUBLANE)
    TM = pl.cdiv(TM, SUBLANE) * SUBLANE
    Bp = pl.cdiv(B, TM) * TM

    x2d = x.reshape(B, -1).astype(jnp.float32)        # flatten (B, 64)
    if Bp == B:
        xp = x2d                                      # no copy needed
    else:
        xp = jnp.zeros((Bp, d_in), jnp.float32).at[:B].set(x2d)

    out_padded = pl.pallas_call(
        mlp_kernel,
        out_shape=jax.ShapeDtypeStruct((Bp, LANE), jnp.float32),
        grid=(Bp // TM,),
        in_specs=[
            pl.BlockSpec((TM, d_in), lambda i: (i, 0)),      # x: batch-tiled
            pl.BlockSpec((d_in, LANE), lambda i: (0, 0)),    # w1: resident
            pl.BlockSpec((1, LANE), lambda i: (0, 0)),       # b1: resident
            pl.BlockSpec((LANE, LANE), lambda i: (0, 0)),    # w2: resident
            pl.BlockSpec((1, LANE), lambda i: (0, 0)),       # b2: resident
        ],
        out_specs=pl.BlockSpec((TM, LANE), lambda i: (i, 0)),
        compiler_params=pltpu.CompilerParams(
            dimension_semantics=("parallel",)),
    )(xp, w1p, b1p, w2p, b2p)

    # Padded batch rows / padded output columns are garbage -- always slice.
    return out_padded[:B, :d_out]


def init_params(key, image_size=(8, 8), digit_nums=10, hidden=100):
    """Deterministic PyTorch-style (uniform +-1/sqrt(fan_in)) initialization.

    Weights stored already transposed as (in_features, out_features) so the
    kernel computes x @ W + b, equivalent to torch's x @ W.T + b.
    """
    d_in = image_size[0] * image_size[1]
    k1, k2, k3, k4 = jax.random.split(key, 4)
    bound1 = 1.0 / jnp.sqrt(jnp.float32(d_in))
    bound2 = 1.0 / jnp.sqrt(jnp.float32(hidden))
    w1 = jax.random.uniform(k1, (d_in, hidden), jnp.float32, -bound1, bound1)
    b1 = jax.random.uniform(k2, (1, hidden), jnp.float32, -bound1, bound1)
    w2 = jax.random.uniform(k3, (hidden, digit_nums), jnp.float32, -bound2, bound2)
    b2 = jax.random.uniform(k4, (1, digit_nums), jnp.float32, -bound2, bound2)
    return w1, b1, w2, b2


if __name__ == "__main__":
    key = jax.random.PRNGKey(0)
    kx, kp = jax.random.split(key)

    B, H, W = 4, 8, 8
    x = jax.random.normal(kx, (B, H, W), jnp.float32)
    w1, b1, w2, b2 = init_params(kp, image_size=(H, W), digit_nums=10, hidden=100)

    # Pad weights ONCE (resident across calls).
    padded = pad_params(w1, b1, w2, b2)

    out = mymodel_forward(x, padded, d_out=10)
    out = jax.block_until_ready(out)

    # Pure-JAX reference of the same math.
    x2d = x.reshape(B, -1)
    ref = jax.nn.sigmoid(jnp.maximum(x2d @ w1 + b1, 0.0) @ w2 + b2)
    assert out.shape == (B, 10)
    assert jnp.allclose(out, ref, atol=1e-3, rtol=1e-3), (
        float(jnp.max(jnp.abs(out - ref))))

    print("KERNEL_OK")
</pallas_src>

<mosaic_0001>
module attributes {stable_mosaic.version = 11 : i64} {
  func.func @mlp_kernel(%arg0: i32, %arg1: memref<8x64xf32, #tpu.memory_space<vmem>>, %arg2: memref<64x128xf32, #tpu.memory_space<vmem>>, %arg3: memref<1x128xf32, #tpu.memory_space<vmem>>, %arg4: memref<128x128xf32, #tpu.memory_space<vmem>>, %arg5: memref<1x128xf32, #tpu.memory_space<vmem>>, %arg6: memref<8x128xf32, #tpu.memory_space<vmem>>) attributes {dimension_semantics = [#tpu.dimension_semantics<parallel>], iteration_bounds = array<i64: 1>, scalar_prefetch = 0 : i64, scratch_operands = 0 : i64, tpu.core_type = #tpu.core_type<tc>, window_params = [{transform_indices = @transform_0, window_bounds = array<i64: 8, 64>}, {pipeline_mode = #tpu.pipeline_mode<synchronous>, transform_indices = @transform_1, window_bounds = array<i64: 64, 128>}, {pipeline_mode = #tpu.pipeline_mode<synchronous>, transform_indices = @transform_2, window_bounds = array<i64: 1, 128>}, {pipeline_mode = #tpu.pipeline_mode<synchronous>, transform_indices = @transform_3, window_bounds = array<i64: 128, 128>}, {pipeline_mode = #tpu.pipeline_mode<synchronous>, transform_indices = @transform_4, window_bounds = array<i64: 1, 128>}, {transform_indices = @transform_5, window_bounds = array<i64: 8, 128>}]} {
    %c0 = arith.constant 0 : index
    %c0_0 = arith.constant 0 : index
    %0 = vector.load %arg1[%c0, %c0_0] : memref<8x64xf32, #tpu.memory_space<vmem>>, vector<8x64xf32>
    %c0_1 = arith.constant 0 : index
    %c0_2 = arith.constant 0 : index
    %1 = vector.load %arg2[%c0_1, %c0_2] : memref<64x128xf32, #tpu.memory_space<vmem>>, vector<64x128xf32>
    %cst = arith.constant dense<0.000000e+00> : vector<8x128xf32>
    %2 = tpu.matmul %0, %1, %cst {dimension_numbers = #tpu.dot_dimension_numbers<[1], [0], [0], [1], [0, 0, 1, 1], [], []>} : vector<8x64xf32>, vector<64x128xf32>, vector<8x128xf32> -> vector<8x128xf32>
    %c0_3 = arith.constant 0 : index
    %c0_4 = arith.constant 0 : index
    %3 = vector.load %arg3[%c0_3, %c0_4] : memref<1x128xf32, #tpu.memory_space<vmem>>, vector<1x128xf32>
    %4 = vector.broadcast %3 : vector<1x128xf32> to vector<8x128xf32>
    %5 = arith.addf %2, %4 : vector<8x128xf32>
    %cst_5 = arith.constant 0.000000e+00 : f32
    %6 = vector.broadcast %cst_5 : f32 to vector<8x128xf32>
    %7 = arith.maximumf %5, %6 : vector<8x128xf32>
    %c0_6 = arith.constant 0 : index
    %c0_7 = arith.constant 0 : index
    %8 = vector.load %arg4[%c0_6, %c0_7] : memref<128x128xf32, #tpu.memory_space<vmem>>, vector<128x128xf32>
    %cst_8 = arith.constant dense<0.000000e+00> : vector<8x128xf32>
    %9 = tpu.matmul %7, %8, %cst_8 {dimension_numbers = #tpu.dot_dimension_numbers<[1], [0], [0], [1], [0, 0, 1, 1], [], []>} : vector<8x128xf32>, vector<128x128xf32>, vector<8x128xf32> -> vector<8x128xf32>
    %c0_9 = arith.constant 0 : index
    %c0_10 = arith.constant 0 : index
    %10 = vector.load %arg5[%c0_9, %c0_10] : memref<1x128xf32, #tpu.memory_space<vmem>>, vector<1x128xf32>
    %11 = vector.broadcast %10 : vector<1x128xf32> to vector<8x128xf32>
    %12 = arith.addf %9, %11 : vector<8x128xf32>
    %cst_11 = arith.constant 5.000000e-01 : f32
    %13 = vector.broadcast %cst_11 : f32 to vector<8x128xf32>
    %14 = arith.mulf %13, %12 : vector<8x128xf32>
    %15 = math.tanh %14 : vector<8x128xf32>
    %cst_12 = arith.constant 5.000000e-01 : f32
    %16 = vector.broadcast %cst_12 : f32 to vector<8x128xf32>
    %17 = arith.mulf %16, %15 : vector<8x128xf32>
    %cst_13 = arith.constant 5.000000e-01 : f32
    %18 = vector.broadcast %cst_13 : f32 to vector<8x128xf32>
    %19 = arith.addf %17, %18 : vector<8x128xf32>
    %c0_14 = arith.constant 0 : index
    %c0_15 = arith.constant 0 : index
    %20 = vector.load %arg6[%c0_14, %c0_15] : memref<8x128xf32, #tpu.memory_space<vmem>>, vector<8x128xf32>
    tpu.vector_store %arg6[%c0_14, %c0_15], %19 {strides = array<i32>} : memref<8x128xf32, #tpu.memory_space<vmem>>, vector<8x128xf32>,
    return
  }
  func.func @transform_0(%arg0: i32) -> (i32, i32) {
    %c0_i32 = arith.constant 0 : i32
    %c0_i32_0 = arith.constant 0 : i32
    return %arg0, %c0_i32 : i32, i32
  }
  func.func @transform_1(%arg0: i32) -> (i32, i32) {
    %c0_i32 = arith.constant 0 : i32
    %c0_i32_0 = arith.constant 0 : i32
    %c0_i32_1 = arith.constant 0 : i32
    return %c0_i32, %c0_i32_0 : i32, i32
  }
  func.func @transform_2(%arg0: i32) -> (i32, i32) {
    %c0_i32 = arith.constant 0 : i32
    %c0_i32_0 = arith.constant 0 : i32
    %c0_i32_1 = arith.constant 0 : i32
    return %c0_i32, %c0_i32_0 : i32, i32
  }
  func.func @transform_3(%arg0: i32) -> (i32, i32) {
    %c0_i32 = arith.constant 0 : i32
    %c0_i32_0 = arith.constant 0 : i32
    %c0_i32_1 = arith.constant 0 : i32
    return %c0_i32, %c0_i32_0 : i32, i32
  }
  func.func @transform_4(%arg0: i32) -> (i32, i32) {
    %c0_i32 = arith.constant 0 : i32
    %c0_i32_0 = arith.constant 0 : i32
    %c0_i32_1 = arith.constant 0 : i32
    return %c0_i32, %c0_i32_0 : i32, i32
  }
  func.func @transform_5(%arg0: i32) -> (i32, i32) {
    %c0_i32 = arith.constant 0 : i32
    %c0_i32_0 = arith.constant 0 : i32
    return %arg0, %c0_i32 : i32, i32
  }
}

</mosaic_0001>

<bundles_post_ra>
// kernel: tpu_custom_call.1
= control target key start
LH: loop header
LB: loop body
LE: loop exit
PB: predicated region body
PF: predicated region fallthrough
CT: control target
= control target key end

     0   :  { %10 = vsyncpa [#allocation3], 0  ;;  %s588_s0 = inlined_call_operand.hbm [shape: f32[8,64], index: 0, kind: input, shape index: {}]   ;;  %s589_s1 = inlined_call_operand.hbm [shape: f32[64,128], index: 1, kind: input, shape index: {}]   ;;  %s590_s2 = inlined_call_operand.vmem [shape: f32[1,128], index: 2, kind: input, shape index: {}]   ;;  %s591_s3 = inlined_call_operand.hbm [shape: f32[128,128], index: 3, kind: input, shape index: {}]   ;;  %s592_s4 = inlined_call_operand.vmem [shape: f32[1,128], index: 4, kind: input, shape index: {}]   ;;  %s593_s5 = inlined_call_operand.hbm [shape: f32[8,128], index: 5, kind: output, shape index: {}]  }
   0x1   :  { %11 = vsyncpa [#allocation6], 0 }
   0x2   :  { %12 = vsyncpa [#allocation4], 0  ;;  %s489_s18 = smov [#allocation5]   ;;  %s395_s22 = scalar_lea.hbm %s589_s1, 1024 }
   0x3   :  { %s28_s19 = sshll.u32 %s489_s18, 4  ;;  %p396_p0 = scmp.ne.s32.totalorder %s589_s1, %s395_s22  ;;  %s29_s19 = int_to_ptr.vmem [resolvable:$true] %s28_s19 }
   0x4   :  { %p399_p1 = scmp.lt.u32.totalorder %s395_s22, %s589_s1 }
   0x6   :  { %p401_p2 = pnand %p399_p1, %p396_p0 }
   0x8   :  { %404 = shalt.err (!%p401_p2)
}
   0x9   :  { %s405_s27 = scalar_lea.vmem %s29_s19, 1024  ;;  %p410_p4 = scmp.lt.s32.totalorder %s29_s19, %s29_s19 }
   0xa   :  { %p406_p3 = scmp.ne.s32.totalorder %s29_s19, %s405_s27  ;;  %p411_p5 = scmp.lt.s32.totalorder %s405_s27, %s405_s27 }
   0xc   :  { %p412_p6 = por %p411_p5, %p410_p4 }
   0xe   :  { %p413_p7 = pnand %p412_p6, %p406_p3 }
  0x10   :  { %416 = shalt.err (!%p413_p7)
}
  0x11   :  { %s490_s28 = smov 128   ;;  %s491_s29 = smov 8  }
  0x12   :  { %34 = dma.hbm_to_vmem [thread:$0]  %s589_s1, 1024, %s29_s19, [#allocation6], %s490_s28, %s490_s28, %s491_s29  }
  0x13   :  { %s492_s7 = smov [#allocation2]   ;;  %s493_s9 = smov [#allocation7]  }
  0x14   :  { %s19_s8 = sshll.u32 %s492_s7, 4  ;;  %s42_s10 = sshll.u32 %s493_s9, 4  ;;  %s20_s8 = int_to_ptr.vmem [resolvable:$true] %s19_s8  ;;  %s43_s10 = int_to_ptr.vmem [resolvable:$true] %s42_s10 }
  0x15   :  { %s417_s13 = scalar_lea.hbm %s588_s0, 128 }
  0x16   :  { %p418_p8 = scmp.ne.s32.totalorder %s588_s0, %s417_s13  ;;  %p421_p9 = scmp.lt.u32.totalorder %s417_s13, %s588_s0 }
  0x18   :  { %p423_p10 = pnand %p421_p9, %p418_p8 }
  0x1a   :  { %426 = shalt.err (!%p423_p10)
}
  0x1b   :  { %s427_s1 = scalar_lea.vmem %s20_s8, 128  ;;  %p432_p12 = scmp.lt.s32.totalorder %s20_s8, %s20_s8 }
  0x1c   :  { %p428_p11 = scmp.ne.s32.totalorder %s20_s8, %s427_s1  ;;  %p433_p13 = scmp.lt.s32.totalorder %s427_s1, %s427_s1 }
  0x1e   :  { %p434_p0 = por %p433_p13, %p432_p12 }
  0x20   :  { %p435_p1 = pnand %p434_p0, %p428_p11 }
  0x22   :  { %438 = shalt.err (!%p435_p1)
}
  0x23   :  { %22 = dma.hbm_to_vmem [thread:$0]  %s588_s0, 128, %s20_s8, [#allocation3]  }
  0x24   :  { %s439_s22 = scalar_lea.hbm %s591_s3, 2048 }
  0x25   :  { %p440_p2 = scmp.ne.s32.totalorder %s591_s3, %s439_s22  ;;  %p443_p3 = scmp.lt.u32.totalorder %s439_s22, %s591_s3 }
  0x27   :  { %p445_p4 = pnand %p443_p3, %p440_p2 }
  0x29   :  { %448 = shalt.err (!%p445_p4)
}
  0x2a   :  { %s449_s27 = scalar_lea.vmem %s43_s10, 2048  ;;  %p454_p6 = scmp.lt.s32.totalorder %s43_s10, %s43_s10 }
  0x2b   :  { %p450_p5 = scmp.ne.s32.totalorder %s43_s10, %s449_s27  ;;  %p455_p7 = scmp.lt.s32.totalorder %s449_s27, %s449_s27 }
  0x2d   :  { %p456_p8 = por %p455_p7, %p454_p6 }
  0x2f   :  { %p457_p9 = pnand %p456_p8, %p450_p5 }
  0x31   :  { %460 = shalt.err (!%p457_p9)
}
  0x32   :  { %48 = dma.hbm_to_vmem [thread:$0]  %s591_s3, 2048, %s43_s10, [#allocation6], %s490_s28, %s490_s28, %s491_s29  }
  0x33   :  { %483 = dma.done.wait [#allocation3], 128  }
  0x34   :  { %484 = vsyncadd [#allocation3], 4294967168 }
  0x35   :  { %485 = dma.done.wait [#allocation6], 3072  }
  0x36   :  { %486 = vsyncadd [#allocation6], 4294964224  ;;  %v494_v0 = vmov 0.0|0.0   ;;  %vm495_vm0 = vmmov 0   ;;  %v496_v1 = vmov 0.0   ;;  %v61_v2 = vld [vmem:[#allocation5] sm:$0xff] }
  0x37   :  { %348 = vmatprep.subr.bf16.mxu0 %v494_v0  ;;  %310 = vmatprep.mubr.msk.f32.mxu0 %vm495_vm0, %v496_v1  ;;  %v62_v3 = vld [vmem:[#allocation5 + $0x8] sm:$0xff]  ;;  %v63_v4 = vld [vmem:[#allocation5 + $0x10] sm:$0xff]  ;;  %v64_v6 = vld [vmem:[#allocation5 + $0x18] sm:$0xff]  ;;  %vm76_vm1 = vcmask 523264   ;;  %s497_s7 = smov [#allocation8]  }
  0x38   :  { %360 = vmatprep.subr.bf16.mxu1 %v494_v0  ;;  %345 = vmatprep.mubr.msk.f32.mxu1 %vm495_vm0, %v496_v1  ;;  %v349_v5 = vpack.c.bf16 %v62_v3, %v61_v2  ;;  %v352_v7 = vpack.c.bf16 %v64_v6, %v63_v4  ;;  %v151_v8 = vld [vmem:[#allocation7] sm:$0xff]  ;;  %v152_v9 = vld [vmem:[#allocation7 + $0x8] sm:$0xff]  ;;  %v153_v10 = vld [vmem:[#allocation7 + $0x10] sm:$0xff]  ;;  %s255_s8 = sshll.u32 %s497_s7, 4  ;;  %s256_s8 = int_to_ptr.vmem [resolvable:$true] %s255_s8 }
  0x39   :  { %v65_v11 = vld [vmem:[#allocation5 + $0x20] sm:$0xff]  ;;  %v66_v12 = vld [vmem:[#allocation5 + $0x28] sm:$0xff]  ;;  %v361_v13 = vpack.c.bf16 %v152_v9, %v151_v8  ;;  %v154_v14 = vld [vmem:[#allocation7 + $0x18] sm:$0xff]  ;;  %p466_p11 = scmp.lt.s32.totalorder %s256_s8, %s256_s8 }
  0x3a   :  { %350 = vmatpush3.bf16.msra.mxu0 %v349_v5  ;;  %v364_v15 = vpack.c.bf16 %v154_v14, %v153_v10  ;;  %v355_v16 = vpack.c.bf16 %v66_v12, %v65_v11  ;;  %v155_v17 = vld [vmem:[#allocation7 + $0x20] sm:$0xff]  ;;  %v156_v18 = vld [vmem:[#allocation7 + $0x28] sm:$0xff]  ;;  %v67_v19 = vld [vmem:[#allocation5 + $0x30] sm:$0xff] }
  0x3b   :  { %351 = vmatprep.subr.bf16.mxu0 %v494_v0  ;;  %362 = vmatpush3.bf16.msra.mxu1 %v361_v13  ;;  %v68_v20 = vld [vmem:[#allocation5 + $0x38] sm:$0xff]  ;;  %v367_v21 = vpack.c.bf16 %v156_v18, %v155_v17  ;;  %v157_v23 = vld [vmem:[#allocation7 + $0x30] sm:$0xff]  ;;  %v159_v27 = vld [vmem:[#allocation7 + $0x40] sm:$0xff] }
  0x3c   :  { %363 = vmatprep.subr.bf16.mxu1 %v494_v0  ;;  %v358_v22 = vpack.c.bf16 %v68_v20, %v67_v19  ;;  %v158_v24 = vld [vmem:[#allocation7 + $0x38] sm:$0xff]  ;;  %v160_v28 = vld [vmem:[#allocation7 + $0x48] sm:$0xff]  ;;  %v161_v30 = vld [vmem:[#allocation7 + $0x50] sm:$0xff] }
  0x3d   :  { %v370_v25 = vpack.c.bf16 %v158_v24, %v157_v23  ;;  %v60_v26 = vld [vmem:[#allocation2] sm:$0xff]  ;;  %v373_v29 = vpack.c.bf16 %v160_v28, %v159_v27  ;;  %v163_v33 = vld [vmem:[#allocation7 + $0x60] sm:$0xff]  ;;  %v164_v34 = vld [vmem:[#allocation7 + $0x68] sm:$0xff] }
  0x3e   :  { %353 = vmatpush3.bf16.msra.mxu0 %v352_v7  ;;  %v162_v31 = vld [vmem:[#allocation7 + $0x58] sm:$0xff]  ;;  %v379_v35 = vpack.c.bf16 %v164_v34, %v163_v33  ;;  %v165_v36 = vld [vmem:[#allocation7 + $0x70] sm:$0xff] }
  0x3f   :  { %354 = vmatprep.subr.bf16.mxu0 %v494_v0  ;;  %365 = vmatpush3.bf16.msra.mxu1 %v364_v15  ;;  %v376_v32 = vpack.c.bf16 %v162_v31, %v161_v30  ;;  %v166_v37 = vld [vmem:[#allocation7 + $0x78] sm:$0xff] }
  0x40   :  { %366 = vmatprep.subr.bf16.mxu1 %v494_v0  ;;  %v382_v38 = vpack.c.bf16 %v166_v37, %v165_v36  ;;  %v265_v39 = vld [vmem:[%s590_s2] ss:$0 sm:$0xff]  ;;  %s461_s2 = scalar_lea.vmem %s256_s8, 128 }
  0x41   :  { %v267_v44 = vld [vmem:[%s592_s4] ss:$0 sm:$0xff]  ;;  %p462_p10 = scmp.ne.s32.totalorder %s256_s8, %s461_s2  ;;  %p467_p12 = scmp.lt.s32.totalorder %s461_s2, %s461_s2 }
  0x42   :  { %356 = vmatpush3.bf16.msra.mxu0 %v355_v16 }
  0x43   :  { %357 = vmatprep.subr.bf16.mxu0 %v494_v0  ;;  %368 = vmatpush3.bf16.msra.mxu1 %v367_v21  ;;  %p468_p13 = por %p467_p12, %p466_p11 }
  0x44   :  { %369 = vmatprep.subr.bf16.mxu1 %v494_v0 }
  0x45   :  { %p469_p0 = pnand %p468_p13, %p462_p10 }
  0x46   :  { %359 = vmatpush3.bf16.msra.mxu0 %v358_v22 }
  0x47   :  { %371 = vmatpush3.bf16.msra.mxu1 %v370_v25 }
  0x48   :  { %372 = vmatprep.subr.bf16.mxu1 %v494_v0 }
  0x49   :  { %311 = vmatmul.mubr.msk.f32.vlgmr.msra.gmra.mrb[0].mxu0 %vm76_vm1, %v60_v26 }
  0x4b   :  { %374 = vmatpush3.bf16.msra.mxu1 %v373_v29 }
  0x4c   :  { %375 = vmatprep.subr.bf16.mxu1 %v494_v0 }
  0x4f   :  { %377 = vmatpush3.bf16.msra.mxu1 %v376_v32 }
  0x50   :  { %378 = vmatprep.subr.bf16.mxu1 %v494_v0 }
  0x53   :  { %380 = vmatpush3.bf16.msra.mxu1 %v379_v35 }
  0x54   :  { %381 = vmatprep.subr.bf16.mxu1 %v494_v0 }
  0x57   :  { %383 = vmatpush3.bf16.msra.mxu1 %v382_v38 }
 0x11c   :  { %v146_v40 = vpop.f32.mrb[0].mxu0 }
 0x11d   :  { %v147_v41 = vadd.f32 %v265_v39, %v146_v40  ;;  %v312_v42 = vpop.f32.mrb[1].mxu0 }
 0x11f   :  { %v150_v43 = vmax.f32 %v147_v41, 0.0 }
 0x121   :  { %346 = vmatmul.mubr.f32.vlgmr.msra.gmra.mrb[0].mxu1 %v150_v43 }
 0x1f4   :  { %v240_v45 = vpop.f32.mrb[0].mxu1 }
 0x1f5   :  { %v241_v46 = vadd.f32 %v267_v44, %v240_v45  ;;  %v347_v47 = vpop.f32.mrb[1].mxu1 }
 0x1f7   :  { %v244_v48 = vmul.f32 0.5, %v241_v46 }
 0x1f9   :  { %393 = vtanh.f32 %v244_v48 }
 0x203   :  { %v394_v49 = vpop.eup %393 }
 0x204   :  { %v246_v50 = vmul.f32 0.5, %v394_v49 }
 0x206   :  { %v247_v51 = vadd.f32 0.5, %v246_v50 }
 0x208   :  { %248 = vst [vmem:[#allocation8] sm:$0xff] %v247_v51 }
 0x209   :  { %472 = shalt.err (!%p469_p0)
}
 0x20a   :  { %s473_s10 = scalar_lea.hbm %s593_s5, 128 }
 0x20b   :  { %p474_p1 = scmp.ne.s32.totalorder %s593_s5, %s473_s10  ;;  %p477_p2 = scmp.lt.u32.totalorder %s473_s10, %s593_s5 }
 0x20d   :  { %p479_p3 = pnand %p477_p2, %p474_p1 }
 0x20f   :  { %482 = shalt.err (!%p479_p3)
}
 0x210   :  { %258 = dma.vmem_to_hbm [thread:$0]  %s256_s8, 128, %s593_s5, [#allocation4]  }
 0x211   :  { %487 = dma.done.wait [#allocation4], 128  }
 0x212   :  { %488 = vsyncadd [#allocation4], 4294967168 }
 0x213   :  { %262 = vsyncpa [#allocation3], 1 }
 0x214   :  { %263 = vsyncpa [#allocation6], 1 }
 0x215   :  { %264 = vsyncpa [#allocation4], 1 }

</bundles_post_ra>
